<compile_context>
chip_gen: v6e
topology: v6e:2x2x1
jax: 0.10.0
libtpu: 0.0.40
codegen_flags: <defaults>
</compile_context>

<pallas_src>
import math
import functools

import jax
import jax.numpy as jnp
from jax import lax
from jax.experimental import pallas as pl
from jax.experimental.pallas import tpu as pltpu


@functools.lru_cache(maxsize=None)
def _vmem_limit_bytes():
    """Generation-aware scoped-VMEM cap: ~75% of physical, capped at 96 MiB."""
    cap = 128 * 1024 * 1024
    try:
        cap = int(getattr(pltpu.get_tpu_info(), "vmem_capacity_bytes", cap))
    except Exception:
        pass
    return min((cap * 3) // 4, 96 * 1024 * 1024)


@functools.lru_cache(maxsize=None)
def _use_bf16_exp():
    """bf16 softmax exp on v6e/v7x (bf16-capable EUP); f32 elsewhere (v5e etc.)."""
    try:
        kind = jax.devices()[0].device_kind.lower()
    except Exception:
        return False
    return ("v6" in kind) or ("v7" in kind)


def _pick_tile(n, target):
    """Largest tile <= target that divides n and is a multiple of 8, else n."""
    if n <= target:
        return n
    for t in range(target, 7, -1):
        if n % t == 0 and t % 8 == 0:
            return t
    return n  # fallback: whole axis (fine for the small demo shapes)


# -----------------------------------------------------------------------------
# Fused QKV projection: one (tm, C) x (C, 3C) MXU matmul per row tile, f32
# accumulation, head-dim scale folded into q, bf16 outputs.
# -----------------------------------------------------------------------------
def _qkv_kernel(x_ref, w_ref, b_ref, q_ref, k_ref, v_ref, *, scale):
    C = q_ref.shape[-1]
    x = x_ref[...].astype(jnp.bfloat16)                      # (tm, C)
    y = jnp.dot(x, w_ref[...],
                preferred_element_type=jnp.float32) + b_ref[...]   # (tm, 3C) f32
    q_ref[...] = (y[:, :C] * scale).astype(jnp.bfloat16)     # scale folded in f32
    k_ref[...] = y[:, C:2 * C].astype(jnp.bfloat16)
    v_ref[...] = y[:, 2 * C:].astype(jnp.bfloat16)


def qkv_projection(x2d, w_qkv_bf16, b_qkv, scale):
    """x2d: (M, C) f32; w_qkv_bf16: (C, 3C) bf16; b_qkv: (3C,) f32.

    Returns q (pre-scaled), k, v as three (M, C) bf16 arrays.
    """
    M, C = x2d.shape
    tm = _pick_tile(M, 512)
    kernel = functools.partial(_qkv_kernel, scale=scale)
    out_sd = jax.ShapeDtypeStruct((M, C), jnp.bfloat16)

    return pl.pallas_call(
        kernel,
        grid=(M // tm,),
        out_shape=(out_sd, out_sd, out_sd),
        in_specs=[pl.BlockSpec((tm, C), lambda i: (i, 0)),
                  pl.BlockSpec((C, 3 * C), lambda i: (0, 0)),
                  pl.BlockSpec((1, 3 * C), lambda i: (0, 0))],
        out_specs=(pl.BlockSpec((tm, C), lambda i: (i, 0)),
                   pl.BlockSpec((tm, C), lambda i: (i, 0)),
                   pl.BlockSpec((tm, C), lambda i: (i, 0))),
        compiler_params=pltpu.CompilerParams(
            dimension_semantics=("parallel",),
            vmem_limit_bytes=_vmem_limit_bytes()),
    )(x2d, w_qkv_bf16, b_qkv.reshape(1, 3 * C))


# -----------------------------------------------------------------------------
# Attention core + fused output projection.
# Grid = (B, N // tq).  Each step sees one q tile (tq, C) and the full K/V rows
# (N, C) for that batch, handles all heads, writes:
#   * attn block (1, H, tq, N) bf16  -> full attention map (lane-dense in N)
#   * out  block (1, tq, C)    f32   -> projected output, already (B, N, C)
# The per-head contexts are accumulated in a (tq, C) bf16 VMEM scratch so the
# final projection matmul reads one lane-dense slab (no concatenate).
# -----------------------------------------------------------------------------
def _attn_kernel(q_ref, k_ref, v_ref, wp_ref, bp_ref, out_ref, attn_ref,
                 ctx_ref, *, heads, bf16_exp):
    C = q_ref.shape[-1]
    D = C // heads

    q = q_ref[0]   # (tq, C) bf16, already scaled by head_dim**-0.5
    k = k_ref[0]   # (N,  C) bf16
    v = v_ref[0]   # (N,  C) bf16

    for h in range(heads):                       # static unroll over heads
        lo = h * D
        q_h = q[:, lo:lo + D]                    # (tq, D)
        k_h = k[:, lo:lo + D]                    # (N, D)
        v_h = v[:, lo:lo + D]                    # (N, D)

        # scores: contract last dims (no explicit K transpose), f32 accumulate.
        s = lax.dot_general(q_h, k_h, (((1,), (1,)), ((), ())),
                            preferred_element_type=jnp.float32)   # (tq, N)

        m = jnp.max(s, axis=-1, keepdims=True)                    # f32
        if bf16_exp:
            # v6e/v7x: bf16 EUP roughly doubles exp throughput.
            e = jnp.exp((s - m).astype(jnp.bfloat16))              # bf16
            denom = jnp.sum(e.astype(jnp.float32), axis=-1, keepdims=True)
            p = e * pl.reciprocal(denom, approx=True).astype(jnp.bfloat16)
        else:
            # v5e and older: no bf16 EUP/VPU, keep elementwise math in f32.
            e = jnp.exp(s - m)
            denom = jnp.sum(e, axis=-1, keepdims=True)
            p = (e * pl.reciprocal(denom, approx=True)).astype(jnp.bfloat16)

        attn_ref[0, h] = p                       # attn_drop: identity (eval)
        ctx_ref[:, lo:lo + D] = jnp.dot(
            p, v_h, preferred_element_type=jnp.float32).astype(jnp.bfloat16)

    # Fused output projection epilogue (proj_drop: identity in eval mode).
    out_ref[0] = (jnp.dot(ctx_ref[...], wp_ref[...],
                          preferred_element_type=jnp.float32) + bp_ref[...])


def attention_core(q, k, v, w_proj_bf16, b_proj, heads):
    """q, k, v: (B, N, C) bf16 -> (out (B, N, C) f32, attn (B, H, N, N) bf16)."""
    B, N, C = q.shape
    tq = _pick_tile(N, 256)
    kernel = functools.partial(_attn_kernel, heads=heads,
                               bf16_exp=_use_bf16_exp())

    q_spec = pl.BlockSpec((1, tq, C), lambda b, i: (b, i, 0))
    kv_spec = pl.BlockSpec((1, N, C), lambda b, i: (b, 0, 0))
    wp_spec = pl.BlockSpec((C, C), lambda b, i: (0, 0))
    bp_spec = pl.BlockSpec((1, C), lambda b, i: (0, 0))
    out_spec = pl.BlockSpec((1, tq, C), lambda b, i: (b, i, 0))
    attn_spec = pl.BlockSpec((1, heads, tq, N), lambda b, i: (b, 0, i, 0))

    return pl.pallas_call(
        kernel,
        grid=(B, N // tq),
        out_shape=(jax.ShapeDtypeStruct((B, N, C), jnp.float32),
                   jax.ShapeDtypeStruct((B, heads, N, N), jnp.bfloat16)),
        in_specs=[q_spec, kv_spec, kv_spec, wp_spec, bp_spec],
        out_specs=(out_spec, attn_spec),
        scratch_shapes=[pltpu.VMEM((tq, C), jnp.bfloat16)],
        compiler_params=pltpu.CompilerParams(
            dimension_semantics=("parallel", "parallel"),
            vmem_limit_bytes=_vmem_limit_bytes()),
    )(q, k, v, w_proj_bf16, b_proj.reshape(1, C))


# -----------------------------------------------------------------------------
# Full forward pass (matches Attention.forward): returns (x_out, attn).
# -----------------------------------------------------------------------------
def attention_forward(x, params, heads):
    B, N, C = x.shape
    head_dim = C // heads
    scale = head_dim ** (-0.5)

    # Pre-cast the (tiny) weights to bf16 once; biases stay f32.
    w_qkv = params["w_qkv"].astype(jnp.bfloat16)
    w_proj = params["w_proj"].astype(jnp.bfloat16)

    q, k, v = qkv_projection(x.reshape(B * N, C), w_qkv, params["b_qkv"], scale)
    q = q.reshape(B, N, C)
    k = k.reshape(B, N, C)
    v = v.reshape(B, N, C)

    out, attn = attention_core(q, k, v, w_proj, params["b_proj"], heads)
    return out, attn


# -----------------------------------------------------------------------------
# Deterministic parameter init (nn.Linear: torch W is (out, in); we store the
# transposed (in, out) form directly for the kernels).
# -----------------------------------------------------------------------------
def init_params(key, dim):
    k1, k2, k3, k4 = jax.random.split(key, 4)
    bound = 1.0 / math.sqrt(dim)
    return {
        "w_qkv": jax.random.uniform(k1, (dim, 3 * dim), jnp.float32, -bound, bound),
        "b_qkv": jax.random.uniform(k2, (3 * dim,), jnp.float32, -bound, bound),
        "w_proj": jax.random.uniform(k3, (dim, dim), jnp.float32, -bound, bound),
        "b_proj": jax.random.uniform(k4, (dim,), jnp.float32, -bound, bound),
    }


def reference_forward(x, params, heads):
    """Pure-JAX f32 reference (mirrors the PyTorch module)."""
    B, N, C = x.shape
    hd = C // heads
    scale = hd ** (-0.5)
    qkv = x.reshape(B * N, C) @ params["w_qkv"] + params["b_qkv"]
    qkv = qkv.reshape(B, N, 3, heads, hd).transpose(2, 0, 3, 1, 4)
    q, k, v = qkv[0], qkv[1], qkv[2]
    scores = jnp.einsum("bhqd,bhkd->bhqk", q, k) * scale
    attn = jax.nn.softmax(scores, axis=-1)
    ctx = jnp.einsum("bhqk,bhkd->bhqd", attn, v)
    ctx = ctx.transpose(0, 2, 1, 3).reshape(B, N, C)
    out = ctx.reshape(B * N, C) @ params["w_proj"] + params["b_proj"]
    return out.reshape(B, N, C), attn


if __name__ == "__main__":
    B, N, C, heads = 2, 8, 32, 4
    key = jax.random.PRNGKey(0)
    kx, kp = jax.random.split(key)

    x = jax.random.normal(kx, (B, N, C), jnp.float32)
    params = init_params(kp, C)

    fwd = jax.jit(attention_forward, static_argnames=("heads",))
    out, attn = fwd(x, params, heads=heads)
    out = jax.block_until_ready(out)
    attn = jax.block_until_ready(attn)

    ref_out, ref_attn = reference_forward(x, params, heads)
    assert out.shape == (B, N, C)
    assert attn.shape == (B, heads, N, N)
    # bf16 intermediates / bf16 attn map + approx reciprocal -> bf16 tolerances.
    assert jnp.allclose(out, ref_out, atol=2e-2, rtol=2e-2), \
        float(jnp.max(jnp.abs(out - ref_out)))
    assert jnp.allclose(attn.astype(jnp.float32), ref_attn, atol=2e-2, rtol=2e-2), \
        float(jnp.max(jnp.abs(attn.astype(jnp.float32) - ref_attn)))

    print("KERNEL_OK")
</pallas_src>

<mosaic_0001>
module attributes {stable_mosaic.version = 11 : i64} {
  func.func @_qkv_kernel(%arg0: i32, %arg1: memref<16x32xf32, #tpu.memory_space<vmem>>, %arg2: memref<32x96xbf16, #tpu.memory_space<vmem>>, %arg3: memref<1x96xf32, #tpu.memory_space<vmem>>, %arg4: memref<16x32xbf16, #tpu.memory_space<vmem>>, %arg5: memref<16x32xbf16, #tpu.memory_space<vmem>>, %arg6: memref<16x32xbf16, #tpu.memory_space<vmem>>) attributes {dimension_semantics = [#tpu.dimension_semantics<parallel>], iteration_bounds = array<i64: 1>, scalar_prefetch = 0 : i64, scratch_operands = 0 : i64, tpu.core_type = #tpu.core_type<tc>, window_params = [{transform_indices = @transform_0, window_bounds = array<i64: 16, 32>}, {pipeline_mode = #tpu.pipeline_mode<synchronous>, transform_indices = @transform_1, window_bounds = array<i64: 32, 96>}, {pipeline_mode = #tpu.pipeline_mode<synchronous>, transform_indices = @transform_2, window_bounds = array<i64: 1, 96>}, {transform_indices = @transform_3, window_bounds = array<i64: 16, 32>}, {transform_indices = @transform_4, window_bounds = array<i64: 16, 32>}, {transform_indices = @transform_5, window_bounds = array<i64: 16, 32>}]} {
    %c0 = arith.constant 0 : index
    %c0_0 = arith.constant 0 : index
    %0 = vector.load %arg1[%c0, %c0_0] : memref<16x32xf32, #tpu.memory_space<vmem>>, vector<16x32xf32>
    %1 = arith.truncf %0 : vector<16x32xf32> to vector<16x32xbf16>
    %c0_1 = arith.constant 0 : index
    %c0_2 = arith.constant 0 : index
    %2 = vector.load %arg2[%c0_1, %c0_2] : memref<32x96xbf16, #tpu.memory_space<vmem>>, vector<32x96xbf16>
    %cst = arith.constant dense<0.000000e+00> : vector<16x96xf32>
    %3 = tpu.matmul %1, %2, %cst {dimension_numbers = #tpu.dot_dimension_numbers<[1], [0], [0], [1], [0, 0, 1, 1], [], []>} : vector<16x32xbf16>, vector<32x96xbf16>, vector<16x96xf32> -> vector<16x96xf32>
    %c0_3 = arith.constant 0 : index
    %c0_4 = arith.constant 0 : index
    %4 = vector.load %arg3[%c0_3, %c0_4] : memref<1x96xf32, #tpu.memory_space<vmem>>, vector<1x96xf32>
    %5 = vector.broadcast %4 : vector<1x96xf32> to vector<16x96xf32>
    %6 = arith.addf %3, %5 : vector<16x96xf32>
    %7 = vector.extract_strided_slice %6 {offsets = [0, 0], sizes = [16, 32], strides = [1, 1]} : vector<16x96xf32> to vector<16x32xf32>
    %cst_5 = arith.constant 0.353553385 : f32
    %8 = vector.broadcast %cst_5 : f32 to vector<16x32xf32>
    %9 = arith.mulf %7, %8 : vector<16x32xf32>
    %10 = arith.truncf %9 : vector<16x32xf32> to vector<16x32xbf16>
    %c0_6 = arith.constant 0 : index
    %c0_7 = arith.constant 0 : index
    %11 = vector.load %arg4[%c0_6, %c0_7] : memref<16x32xbf16, #tpu.memory_space<vmem>>, vector<16x32xbf16>
    tpu.vector_store %arg4[%c0_6, %c0_7], %10 {strides = array<i32>} : memref<16x32xbf16, #tpu.memory_space<vmem>>, vector<16x32xbf16>,
    %12 = vector.extract_strided_slice %6 {offsets = [0, 32], sizes = [16, 32], strides = [1, 1]} : vector<16x96xf32> to vector<16x32xf32>
    %13 = arith.truncf %12 : vector<16x32xf32> to vector<16x32xbf16>
    %c0_8 = arith.constant 0 : index
    %c0_9 = arith.constant 0 : index
    %14 = vector.load %arg5[%c0_8, %c0_9] : memref<16x32xbf16, #tpu.memory_space<vmem>>, vector<16x32xbf16>
    tpu.vector_store %arg5[%c0_8, %c0_9], %13 {strides = array<i32>} : memref<16x32xbf16, #tpu.memory_space<vmem>>, vector<16x32xbf16>,
    %15 = vector.extract_strided_slice %6 {offsets = [0, 64], sizes = [16, 32], strides = [1, 1]} : vector<16x96xf32> to vector<16x32xf32>
    %16 = arith.truncf %15 : vector<16x32xf32> to vector<16x32xbf16>
    %c0_10 = arith.constant 0 : index
    %c0_11 = arith.constant 0 : index
    %17 = vector.load %arg6[%c0_10, %c0_11] : memref<16x32xbf16, #tpu.memory_space<vmem>>, vector<16x32xbf16>
    tpu.vector_store %arg6[%c0_10, %c0_11], %16 {strides = array<i32>} : memref<16x32xbf16, #tpu.memory_space<vmem>>, vector<16x32xbf16>,
    return
  }
  func.func @transform_0(%arg0: i32) -> (i32, i32) {
    %c0_i32 = arith.constant 0 : i32
    %c0_i32_0 = arith.constant 0 : i32
    return %arg0, %c0_i32 : i32, i32
  }
  func.func @transform_1(%arg0: i32) -> (i32, i32) {
    %c0_i32 = arith.constant 0 : i32
    %c0_i32_0 = arith.constant 0 : i32
    %c0_i32_1 = arith.constant 0 : i32
    return %c0_i32, %c0_i32_0 : i32, i32
  }
  func.func @transform_2(%arg0: i32) -> (i32, i32) {
    %c0_i32 = arith.constant 0 : i32
    %c0_i32_0 = arith.constant 0 : i32
    %c0_i32_1 = arith.constant 0 : i32
    return %c0_i32, %c0_i32_0 : i32, i32
  }
  func.func @transform_3(%arg0: i32) -> (i32, i32) {
    %c0_i32 = arith.constant 0 : i32
    %c0_i32_0 = arith.constant 0 : i32
    return %arg0, %c0_i32 : i32, i32
  }
  func.func @transform_4(%arg0: i32) -> (i32, i32) {
    %c0_i32 = arith.constant 0 : i32
    %c0_i32_0 = arith.constant 0 : i32
    return %arg0, %c0_i32 : i32, i32
  }
  func.func @transform_5(%arg0: i32) -> (i32, i32) {
    %c0_i32 = arith.constant 0 : i32
    %c0_i32_0 = arith.constant 0 : i32
    return %arg0, %c0_i32 : i32, i32
  }
}

module attributes {stable_mosaic.version = 11 : i64} {
  func.func @_attn_kernel(%arg0: i32, %arg1: i32, %arg2: memref<1x8x32xbf16, #tpu.memory_space<vmem>>, %arg3: memref<1x8x32xbf16, #tpu.memory_space<vmem>>, %arg4: memref<1x8x32xbf16, #tpu.memory_space<vmem>>, %arg5: memref<32x32xbf16, #tpu.memory_space<vmem>>, %arg6: memref<1x32xf32, #tpu.memory_space<vmem>>, %arg7: memref<1x8x32xf32, #tpu.memory_space<vmem>>, %arg8: memref<1x4x8x8xbf16, #tpu.memory_space<vmem>>, %arg9: memref<8x32xbf16, #tpu.memory_space<vmem>>) attributes {dimension_semantics = [#tpu.dimension_semantics<parallel>, #tpu.dimension_semantics<parallel>], iteration_bounds = array<i64: 2, 1>, scalar_prefetch = 0 : i64, scratch_operands = 1 : i64, tpu.core_type = #tpu.core_type<tc>, window_params = [{transform_indices = @transform_0, window_bounds = array<i64: 1, 8, 32>}, {transform_indices = @transform_1, window_bounds = array<i64: 1, 8, 32>}, {transform_indices = @transform_2, window_bounds = array<i64: 1, 8, 32>}, {pipeline_mode = #tpu.pipeline_mode<synchronous>, transform_indices = @transform_3, window_bounds = array<i64: 32, 32>}, {pipeline_mode = #tpu.pipeline_mode<synchronous>, transform_indices = @transform_4, window_bounds = array<i64: 1, 32>}, {transform_indices = @transform_5, window_bounds = array<i64: 1, 8, 32>}, {transform_indices = @transform_6, window_bounds = array<i64: 1, 4, 8, 8>}]} {
    %c0 = arith.constant 0 : index
    %c0_0 = arith.constant 0 : index
    %c0_1 = arith.constant 0 : index
    %0 = vector.load %arg2[%c0, %c0_0, %c0_1] : memref<1x8x32xbf16, #tpu.memory_space<vmem>>, vector<1x8x32xbf16>
    %1 = vector.shape_cast %0 : vector<1x8x32xbf16> to vector<8x32xbf16>
    %c0_2 = arith.constant 0 : index
    %c0_3 = arith.constant 0 : index
    %c0_4 = arith.constant 0 : index
    %2 = vector.load %arg3[%c0_2, %c0_3, %c0_4] : memref<1x8x32xbf16, #tpu.memory_space<vmem>>, vector<1x8x32xbf16>
    %3 = vector.shape_cast %2 : vector<1x8x32xbf16> to vector<8x32xbf16>
    %c0_5 = arith.constant 0 : index
    %c0_6 = arith.constant 0 : index
    %c0_7 = arith.constant 0 : index
    %4 = vector.load %arg4[%c0_5, %c0_6, %c0_7] : memref<1x8x32xbf16, #tpu.memory_space<vmem>>, vector<1x8x32xbf16>
    %5 = vector.shape_cast %4 : vector<1x8x32xbf16> to vector<8x32xbf16>
    %6 = vector.extract_strided_slice %1 {offsets = [0, 0], sizes = [8, 8], strides = [1, 1]} : vector<8x32xbf16> to vector<8x8xbf16>
    %7 = vector.extract_strided_slice %3 {offsets = [0, 0], sizes = [8, 8], strides = [1, 1]} : vector<8x32xbf16> to vector<8x8xbf16>
    %8 = vector.extract_strided_slice %5 {offsets = [0, 0], sizes = [8, 8], strides = [1, 1]} : vector<8x32xbf16> to vector<8x8xbf16>
    %cst = arith.constant dense<0.000000e+00> : vector<8x8xf32>
    %9 = tpu.matmul %6, %7, %cst {dimension_numbers = #tpu.dot_dimension_numbers<[1], [1], [0], [0], [0, 0, 1, 0], [], []>} : vector<8x8xbf16>, vector<8x8xbf16>, vector<8x8xf32> -> vector<8x8xf32>
    %cst_8 = arith.constant dense<0xFF800000> : vector<8xf32>
    %10 = vector.multi_reduction <maximumf>, %9, %cst_8 [1] : vector<8x8xf32> to vector<8xf32>
    %11 = vector.shape_cast %10 : vector<8xf32> to vector<8x1xf32>
    %12 = vector.broadcast %11 : vector<8x1xf32> to vector<8x8xf32>
    %13 = arith.subf %9, %12 : vector<8x8xf32>
    %14 = math.exp %13 : vector<8x8xf32>
    %cst_9 = arith.constant dense<0.000000e+00> : vector<8xf32>
    %15 = vector.multi_reduction <add>, %14, %cst_9 [1] : vector<8x8xf32> to vector<8xf32>
    %16 = vector.shape_cast %15 : vector<8xf32> to vector<8x1xf32>
    %17 = tpu.reciprocal %16 {approx = true} : vector<8x1xf32> -> vector<8x1xf32>
    %18 = vector.broadcast %17 : vector<8x1xf32> to vector<8x8xf32>
    %19 = arith.mulf %14, %18 : vector<8x8xf32>
    %20 = arith.truncf %19 : vector<8x8xf32> to vector<8x8xbf16>
    %c0_10 = arith.constant 0 : index
    %c0_11 = arith.constant 0 : index
    %c0_12 = arith.constant 0 : index
    %c0_13 = arith.constant 0 : index
    %21 = vector.load %arg8[%c0_10, %c0_11, %c0_12, %c0_13] : memref<1x4x8x8xbf16, #tpu.memory_space<vmem>>, vector<1x1x8x8xbf16>
    %22 = vector.shape_cast %21 : vector<1x1x8x8xbf16> to vector<8x8xbf16>
    %23 = vector.shape_cast %20 : vector<8x8xbf16> to vector<1x1x8x8xbf16>
    tpu.vector_store %arg8[%c0_10, %c0_11, %c0_12, %c0_13], %23 {strides = array<i32>} : memref<1x4x8x8xbf16, #tpu.memory_space<vmem>>, vector<1x1x8x8xbf16>,
    %cst_14 = arith.constant dense<0.000000e+00> : vector<8x8xf32>
    %24 = tpu.matmul %20, %8, %cst_14 {dimension_numbers = #tpu.dot_dimension_numbers<[1], [0], [0], [1], [0, 0, 1, 1], [], []>} : vector<8x8xbf16>, vector<8x8xbf16>, vector<8x8xf32> -> vector<8x8xf32>
    %25 = arith.truncf %24 : vector<8x8xf32> to vector<8x8xbf16>
    %c0_15 = arith.constant 0 : index
    %c0_16 = arith.constant 0 : index
    %26 = vector.load %arg9[%c0_15, %c0_16] : memref<8x32xbf16, #tpu.memory_space<vmem>>, vector<8x8xbf16>
    tpu.vector_store %arg9[%c0_15, %c0_16], %25 {strides = array<i32>} : memref<8x32xbf16, #tpu.memory_space<vmem>>, vector<8x8xbf16>,
    %27 = vector.extract_strided_slice %1 {offsets = [0, 8], sizes = [8, 8], strides = [1, 1]} : vector<8x32xbf16> to vector<8x8xbf16>
    %28 = vector.extract_strided_slice %3 {offsets = [0, 8], sizes = [8, 8], strides = [1, 1]} : vector<8x32xbf16> to vector<8x8xbf16>
    %29 = vector.extract_strided_slice %5 {offsets = [0, 8], sizes = [8, 8], strides = [1, 1]} : vector<8x32xbf16> to vector<8x8xbf16>
    %cst_17 = arith.constant dense<0.000000e+00> : vector<8x8xf32>
    %30 = tpu.matmul %27, %28, %cst_17 {dimension_numbers = #tpu.dot_dimension_numbers<[1], [1], [0], [0], [0, 0, 1, 0], [], []>} : vector<8x8xbf16>, vector<8x8xbf16>, vector<8x8xf32> -> vector<8x8xf32>
    %cst_18 = arith.constant dense<0xFF800000> : vector<8xf32>
    %31 = vector.multi_reduction <maximumf>, %30, %cst_18 [1] : vector<8x8xf32> to vector<8xf32>
    %32 = vector.shape_cast %31 : vector<8xf32> to vector<8x1xf32>
    %33 = vector.broadcast %32 : vector<8x1xf32> to vector<8x8xf32>
    %34 = arith.subf %30, %33 : vector<8x8xf32>
    %35 = math.exp %34 : vector<8x8xf32>
    %cst_19 = arith.constant dense<0.000000e+00> : vector<8xf32>
    %36 = vector.multi_reduction <add>, %35, %cst_19 [1] : vector<8x8xf32> to vector<8xf32>
    %37 = vector.shape_cast %36 : vector<8xf32> to vector<8x1xf32>
    %38 = tpu.reciprocal %37 {approx = true} : vector<8x1xf32> -> vector<8x1xf32>
    %39 = vector.broadcast %38 : vector<8x1xf32> to vector<8x8xf32>
    %40 = arith.mulf %35, %39 : vector<8x8xf32>
    %41 = arith.truncf %40 : vector<8x8xf32> to vector<8x8xbf16>
    %c0_20 = arith.constant 0 : index
    %c1 = arith.constant 1 : index
    %c0_21 = arith.constant 0 : index
    %c0_22 = arith.constant 0 : index
    %42 = vector.load %arg8[%c0_20, %c1, %c0_21, %c0_22] : memref<1x4x8x8xbf16, #tpu.memory_space<vmem>>, vector<1x1x8x8xbf16>
    %43 = vector.shape_cast %42 : vector<1x1x8x8xbf16> to vector<8x8xbf16>
    %44 = vector.shape_cast %41 : vector<8x8xbf16> to vector<1x1x8x8xbf16>
    tpu.vector_store %arg8[%c0_20, %c1, %c0_21, %c0_22], %44 {strides = array<i32>} : memref<1x4x8x8xbf16, #tpu.memory_space<vmem>>, vector<1x1x8x8xbf16>,
    %cst_23 = arith.constant dense<0.000000e+00> : vector<8x8xf32>
    %45 = tpu.matmul %41, %29, %cst_23 {dimension_numbers = #tpu.dot_dimension_numbers<[1], [0], [0], [1], [0, 0, 1, 1], [], []>} : vector<8x8xbf16>, vector<8x8xbf16>, vector<8x8xf32> -> vector<8x8xf32>
    %46 = arith.truncf %45 : vector<8x8xf32> to vector<8x8xbf16>
    %c0_24 = arith.constant 0 : index
    %c8 = arith.constant 8 : index
    %47 = vector.load %arg9[%c0_24, %c8] : memref<8x32xbf16, #tpu.memory_space<vmem>>, vector<8x8xbf16>
    tpu.vector_store %arg9[%c0_24, %c8], %46 {strides = array<i32>} : memref<8x32xbf16, #tpu.memory_space<vmem>>, vector<8x8xbf16>,
    %48 = vector.extract_strided_slice %1 {offsets = [0, 16], sizes = [8, 8], strides = [1, 1]} : vector<8x32xbf16> to vector<8x8xbf16>
    %49 = vector.extract_strided_slice %3 {offsets = [0, 16], sizes = [8, 8], strides = [1, 1]} : vector<8x32xbf16> to vector<8x8xbf16>
    %50 = vector.extract_strided_slice %5 {offsets = [0, 16], sizes = [8, 8], strides = [1, 1]} : vector<8x32xbf16> to vector<8x8xbf16>
    %cst_25 = arith.constant dense<0.000000e+00> : vector<8x8xf32>
    %51 = tpu.matmul %48, %49, %cst_25 {dimension_numbers = #tpu.dot_dimension_numbers<[1], [1], [0], [0], [0, 0, 1, 0], [], []>} : vector<8x8xbf16>, vector<8x8xbf16>, vector<8x8xf32> -> vector<8x8xf32>
    %cst_26 = arith.constant dense<0xFF800000> : vector<8xf32>
    %52 = vector.multi_reduction <maximumf>, %51, %cst_26 [1] : vector<8x8xf32> to vector<8xf32>
    %53 = vector.shape_cast %52 : vector<8xf32> to vector<8x1xf32>
    %54 = vector.broadcast %53 : vector<8x1xf32> to vector<8x8xf32>
    %55 = arith.subf %51, %54 : vector<8x8xf32>
    %56 = math.exp %55 : vector<8x8xf32>
    %cst_27 = arith.constant dense<0.000000e+00> : vector<8xf32>
    %57 = vector.multi_reduction <add>, %56, %cst_27 [1] : vector<8x8xf32> to vector<8xf32>
    %58 = vector.shape_cast %57 : vector<8xf32> to vector<8x1xf32>
    %59 = tpu.reciprocal %58 {approx = true} : vector<8x1xf32> -> vector<8x1xf32>
    %60 = vector.broadcast %59 : vector<8x1xf32> to vector<8x8xf32>
    %61 = arith.mulf %56, %60 : vector<8x8xf32>
    %62 = arith.truncf %61 : vector<8x8xf32> to vector<8x8xbf16>
    %c0_28 = arith.constant 0 : index
    %c2 = arith.constant 2 : index
    %c0_29 = arith.constant 0 : index
    %c0_30 = arith.constant 0 : index
    %63 = vector.load %arg8[%c0_28, %c2, %c0_29, %c0_30] : memref<1x4x8x8xbf16, #tpu.memory_space<vmem>>, vector<1x1x8x8xbf16>
    %64 = vector.shape_cast %63 : vector<1x1x8x8xbf16> to vector<8x8xbf16>
    %65 = vector.shape_cast %62 : vector<8x8xbf16> to vector<1x1x8x8xbf16>
    tpu.vector_store %arg8[%c0_28, %c2, %c0_29, %c0_30], %65 {strides = array<i32>} : memref<1x4x8x8xbf16, #tpu.memory_space<vmem>>, vector<1x1x8x8xbf16>,
    %cst_31 = arith.constant dense<0.000000e+00> : vector<8x8xf32>
    %66 = tpu.matmul %62, %50, %cst_31 {dimension_numbers = #tpu.dot_dimension_numbers<[1], [0], [0], [1], [0, 0, 1, 1], [], []>} : vector<8x8xbf16>, vector<8x8xbf16>, vector<8x8xf32> -> vector<8x8xf32>
    %67 = arith.truncf %66 : vector<8x8xf32> to vector<8x8xbf16>
    %c0_32 = arith.constant 0 : index
    %c16 = arith.constant 16 : index
    %68 = vector.load %arg9[%c0_32, %c16] : memref<8x32xbf16, #tpu.memory_space<vmem>>, vector<8x8xbf16>
    tpu.vector_store %arg9[%c0_32, %c16], %67 {strides = array<i32>} : memref<8x32xbf16, #tpu.memory_space<vmem>>, vector<8x8xbf16>,
    %69 = vector.extract_strided_slice %1 {offsets = [0, 24], sizes = [8, 8], strides = [1, 1]} : vector<8x32xbf16> to vector<8x8xbf16>
    %70 = vector.extract_strided_slice %3 {offsets = [0, 24], sizes = [8, 8], strides = [1, 1]} : vector<8x32xbf16> to vector<8x8xbf16>
    %71 = vector.extract_strided_slice %5 {offsets = [0, 24], sizes = [8, 8], strides = [1, 1]} : vector<8x32xbf16> to vector<8x8xbf16>
    %cst_33 = arith.constant dense<0.000000e+00> : vector<8x8xf32>
    %72 = tpu.matmul %69, %70, %cst_33 {dimension_numbers = #tpu.dot_dimension_numbers<[1], [1], [0], [0], [0, 0, 1, 0], [], []>} : vector<8x8xbf16>, vector<8x8xbf16>, vector<8x8xf32> -> vector<8x8xf32>
    %cst_34 = arith.constant dense<0xFF800000> : vector<8xf32>
    %73 = vector.multi_reduction <maximumf>, %72, %cst_34 [1] : vector<8x8xf32> to vector<8xf32>
    %74 = vector.shape_cast %73 : vector<8xf32> to vector<8x1xf32>
    %75 = vector.broadcast %74 : vector<8x1xf32> to vector<8x8xf32>
    %76 = arith.subf %72, %75 : vector<8x8xf32>
    %77 = math.exp %76 : vector<8x8xf32>
    %cst_35 = arith.constant dense<0.000000e+00> : vector<8xf32>
    %78 = vector.multi_reduction <add>, %77, %cst_35 [1] : vector<8x8xf32> to vector<8xf32>
    %79 = vector.shape_cast %78 : vector<8xf32> to vector<8x1xf32>
    %80 = tpu.reciprocal %79 {approx = true} : vector<8x1xf32> -> vector<8x1xf32>
    %81 = vector.broadcast %80 : vector<8x1xf32> to vector<8x8xf32>
    %82 = arith.mulf %77, %81 : vector<8x8xf32>
    %83 = arith.truncf %82 : vector<8x8xf32> to vector<8x8xbf16>
    %c0_36 = arith.constant 0 : index
    %c3 = arith.constant 3 : index
    %c0_37 = arith.constant 0 : index
    %c0_38 = arith.constant 0 : index
    %84 = vector.load %arg8[%c0_36, %c3, %c0_37, %c0_38] : memref<1x4x8x8xbf16, #tpu.memory_space<vmem>>, vector<1x1x8x8xbf16>
    %85 = vector.shape_cast %84 : vector<1x1x8x8xbf16> to vector<8x8xbf16>
    %86 = vector.shape_cast %83 : vector<8x8xbf16> to vector<1x1x8x8xbf16>
    tpu.vector_store %arg8[%c0_36, %c3, %c0_37, %c0_38], %86 {strides = array<i32>} : memref<1x4x8x8xbf16, #tpu.memory_space<vmem>>, vector<1x1x8x8xbf16>,
    %cst_39 = arith.constant dense<0.000000e+00> : vector<8x8xf32>
    %87 = tpu.matmul %83, %71, %cst_39 {dimension_numbers = #tpu.dot_dimension_numbers<[1], [0], [0], [1], [0, 0, 1, 1], [], []>} : vector<8x8xbf16>, vector<8x8xbf16>, vector<8x8xf32> -> vector<8x8xf32>
    %88 = arith.truncf %87 : vector<8x8xf32> to vector<8x8xbf16>
    %c0_40 = arith.constant 0 : index
    %c24 = arith.constant 24 : index
    %89 = vector.load %arg9[%c0_40, %c24] : memref<8x32xbf16, #tpu.memory_space<vmem>>, vector<8x8xbf16>
    tpu.vector_store %arg9[%c0_40, %c24], %88 {strides = array<i32>} : memref<8x32xbf16, #tpu.memory_space<vmem>>, vector<8x8xbf16>,
    %c0_41 = arith.constant 0 : index
    %c0_42 = arith.constant 0 : index
    %90 = vector.load %arg9[%c0_41, %c0_42] : memref<8x32xbf16, #tpu.memory_space<vmem>>, vector<8x32xbf16>
    %c0_43 = arith.constant 0 : index
    %c0_44 = arith.constant 0 : index
    %91 = vector.load %arg5[%c0_43, %c0_44] : memref<32x32xbf16, #tpu.memory_space<vmem>>, vector<32x32xbf16>
    %cst_45 = arith.constant dense<0.000000e+00> : vector<8x32xf32>
    %92 = tpu.matmul %90, %91, %cst_45 {dimension_numbers = #tpu.dot_dimension_numbers<[1], [0], [0], [1], [0, 0, 1, 1], [], []>} : vector<8x32xbf16>, vector<32x32xbf16>, vector<8x32xf32> -> vector<8x32xf32>
    %c0_46 = arith.constant 0 : index
    %c0_47 = arith.constant 0 : index
    %93 = vector.load %arg6[%c0_46, %c0_47] : memref<1x32xf32, #tpu.memory_space<vmem>>, vector<1x32xf32>
    %94 = vector.broadcast %93 : vector<1x32xf32> to vector<8x32xf32>
    %95 = arith.addf %92, %94 : vector<8x32xf32>
    %c0_48 = arith.constant 0 : index
    %c0_49 = arith.constant 0 : index
    %c0_50 = arith.constant 0 : index
    %96 = vector.load %arg7[%c0_48, %c0_49, %c0_50] : memref<1x8x32xf32, #tpu.memory_space<vmem>>, vector<1x8x32xf32>
    %97 = vector.shape_cast %96 : vector<1x8x32xf32> to vector<8x32xf32>
    %98 = vector.shape_cast %95 : vector<8x32xf32> to vector<1x8x32xf32>
    tpu.vector_store %arg7[%c0_48, %c0_49, %c0_50], %98 {strides = array<i32>} : memref<1x8x32xf32, #tpu.memory_space<vmem>>, vector<1x8x32xf32>,
    return
  }
  func.func @transform_0(%arg0: i32, %arg1: i32) -> (i32, i32, i32) {
    %c0_i32 = arith.constant 0 : i32
    %c0_i32_0 = arith.constant 0 : i32
    return %arg0, %arg1, %c0_i32 : i32, i32, i32
  }
  func.func @transform_1(%arg0: i32, %arg1: i32) -> (i32, i32, i32) {
    %c0_i32 = arith.constant 0 : i32
    %c0_i32_0 = arith.constant 0 : i32
    %c0_i32_1 = arith.constant 0 : i32
    return %arg0, %c0_i32, %c0_i32_0 : i32, i32, i32
  }
  func.func @transform_2(%arg0: i32, %arg1: i32) -> (i32, i32, i32) {
    %c0_i32 = arith.constant 0 : i32
    %c0_i32_0 = arith.constant 0 : i32
    %c0_i32_1 = arith.constant 0 : i32
    return %arg0, %c0_i32, %c0_i32_0 : i32, i32, i32
  }
  func.func @transform_3(%arg0: i32, %arg1: i32) -> (i32, i32) {
    %c0_i32 = arith.constant 0 : i32
    %c0_i32_0 = arith.constant 0 : i32
    %c0_i32_1 = arith.constant 0 : i32
    return %c0_i32, %c0_i32_0 : i32, i32
  }
  func.func @transform_4(%arg0: i32, %arg1: i32) -> (i32, i32) {
    %c0_i32 = arith.constant 0 : i32
    %c0_i32_0 = arith.constant 0 : i32
    %c0_i32_1 = arith.constant 0 : i32
    return %c0_i32, %c0_i32_0 : i32, i32
  }
  func.func @transform_5(%arg0: i32, %arg1: i32) -> (i32, i32, i32) {
    %c0_i32 = arith.constant 0 : i32
    %c0_i32_0 = arith.constant 0 : i32
    return %arg0, %arg1, %c0_i32 : i32, i32, i32
  }
  func.func @transform_6(%arg0: i32, %arg1: i32) -> (i32, i32, i32, i32) {
    %c0_i32 = arith.constant 0 : i32
    %c0_i32_0 = arith.constant 0 : i32
    %c0_i32_1 = arith.constant 0 : i32
    return %arg0, %c0_i32, %arg1, %c0_i32_0 : i32, i32, i32, i32
  }
}

</mosaic_0001>

<bundles_post_ra>
// kernel: attention_forward.2
= control target key start
LH: loop header
LB: loop body
LE: loop exit
PB: predicated region body
PF: predicated region fallthrough
CT: control target
= control target key end

     0   :  { %v165_v0 = vmov 0.0   ;;  %vm166_vm0 = vmmov 0   ;;  %vm44_vm1 = vcmask 261120   ;;  %vm99_vm2 = vcmask 257024   ;;  %s238_s1 = inlined_call_operand.vmem [shape: bf16[32,96], index: 1, kind: input, shape index: {}]   ;;  %s239_s0 = inlined_call_operand.vmem [shape: f32[16,32], index: 0, kind: input, shape index: {}]   ;;  %s240_s2 = inlined_call_operand.vmem [shape: f32[1,96], index: 2, kind: input, shape index: {}]   ;;  %s241_s3 = inlined_call_operand.vmem [shape: bf16[16,32], index: 3, kind: output, shape index: {0}]   ;;  %s242_s5 = inlined_call_operand.vmem [shape: bf16[16,32], index: 5, kind: output, shape index: {2}]   ;;  %s243_s4 = inlined_call_operand.vmem [shape: bf16[16,32], index: 4, kind: output, shape index: {1}]  }
   0x1   :  { %151 = vmatprep.subr.bf16.mxu0 %v165_v0  ;;  %v163_v1 = vld [vmem:[%s238_s1 + $0x8] sm:$0xff]   ;;  %155 = vmatprep.mubr.msk.bf16.mxu0 %vm166_vm0, %v165_v0  ;;  %v164_v2 = vld [vmem:[%s238_s1] sm:$0xff]   ;;  %s167_s1 = smov 64  }
   0x2   :  { %152 = vmatpush3.bf16.msra.mxu0 %v163_v1  ;;  %v18_v3 = vld [vmem:[%s239_s0] sm:$0xff]  ;;  %v19_v4 = vld [vmem:[%s239_s0 + $0x8] sm:$0xff]  ;;  %s168_s0 = smov 96  }
   0x3   :  { %153 = vmatprep.subr.bf16.mxu0 %v165_v0  ;;  %v20_v5 = vpack.c.bf16 %v19_v4, %v18_v3  ;;  %v136_v6 = vld [vmem:[%s240_s2] ss:$0 sm:$0xff] }
   0x6   :  { %154 = vmatpush3.bf16.msra.mxu0 %v164_v2 }
   0x9   :  { %156 = vmatmul.mubr.msk.bf16.vlgmr.msra.gmra.mxu0 %vm44_vm1, %v20_v5 }
  0xc9   :  { %v82_v7 = vpop.f32.mrf.mxu0 }
  0xca   :  { %v83_v8 = vadd.f32 %v136_v6, %v82_v7 }
  0xcb   :  { %v157_v9 = vpop.f32.mrf.mxu0 }
  0xcc   :  { %v89_v10 = vmul.f32 0.35355338, %v83_v8  ;;  %v146_v11 = vpack.c.bf16 %v83_v8, %v83_v8 }
  0xcd   :  { %v85_v12 = vpop.f32.mrf.mxu0 }
  0xce   :  { %v144_v13 = vpack.c.bf16 %v89_v10, %v89_v10  ;;  %v86_v14 = vadd.f32 %v136_v6, %v85_v12  ;;  %116 = vrot.lane.b32.xlu1 %v146_v11, %s167_s1  ;;  %108 = vrot.lane.b32.xlu0 %v146_v11, %s168_s0 }
  0xcf   :  { %v158_v15 = vpop.f32.mrf.mxu0 }
  0xd0   :  { %100 = vst.msk [vmem:[%s241_s3] sm:$0xf] %vm99_vm2, %v144_v13  ;;  %v90_v16 = vmul.f32 0.35355338, %v86_v14  ;;  %v147_v17 = vpack.c.bf16 %v86_v14, %v86_v14 }
  0xd2   :  { %v145_v18 = vpack.c.bf16 %v90_v16, %v90_v16  ;;  %118 = vrot.lane.b32.xlu1 %v147_v17, %s167_s1  ;;  %110 = vrot.lane.b32.xlu0 %v147_v17, %s168_s0 }
  0xd4   :  { %101 = vst.msk [vmem:[%s241_s3 + $0x4] sm:$0xf] %vm99_vm2, %v145_v18 }
 0x140   :  { %v117_v19 = vpop.permute.xlu1 %116  ;;  %v109_v20 = vpop.permute.xlu0 %108 }
 0x141   :  { %122 = vst.msk [vmem:[%s242_s5] sm:$0xf] %vm99_vm2, %v117_v19  ;;  %114 = vst.msk [vmem:[%s243_s4] sm:$0xf] %vm99_vm2, %v109_v20 }
 0x144   :  { %v119_v21 = vpop.permute.xlu1 %118  ;;  %v111_v22 = vpop.permute.xlu0 %110 }
 0x145   :  { %123 = vst.msk [vmem:[%s242_s5 + $0x4] sm:$0xf] %vm99_vm2, %v119_v21  ;;  %115 = vst.msk [vmem:[%s243_s4 + $0x4] sm:$0xf] %vm99_vm2, %v111_v22 }

// kernel: attention_forward.3
= control target key start
LH: loop header
LB: loop body
LE: loop exit
PB: predicated region body
PF: predicated region fallthrough
CT: control target
= control target key end

     0   :  { %s1650_s0 = inlined_call_operand.vmem [shape: bf16[2,8,32], index: 0, kind: input, shape index: {}]   ;;  %s1651_s1 = inlined_call_operand.vmem [shape: bf16[2,8,32], index: 1, kind: input, shape index: {}]   ;;  %s1652_s2 = inlined_call_operand.vmem [shape: bf16[2,8,32], index: 2, kind: input, shape index: {}]   ;;  %s1653_s3 = inlined_call_operand.vmem [shape: bf16[32,32], index: 3, kind: input, shape index: {}]   ;;  %s1654_s4 = inlined_call_operand.vmem [shape: f32[1,32], index: 4, kind: input, shape index: {}]   ;;  %s1655_s5 = inlined_call_operand.hbm [shape: f32[2,8,32], index: 5, kind: output, shape index: {0}]   ;;  %s1656_s6 = inlined_call_operand.hbm [shape: bf16[2,4,8,8], index: 6, kind: output, shape index: {1}]  }
   0x1   :  { %1657 = sst [smem:[#allocation9_spill]] %s1650_s0 }
   0x2   :  { %12 = vsyncpa [#allocation4], 0 }
   0x3   :  { %14 = vsyncpa [#allocation4 + $0x1], 0 }
   0x4   :  { %15 = vsyncpa [#allocation6], 0 }
   0x5   :  { %17 = vsyncpa [#allocation6 + $0x1], 0  ;;  %s1403_s21 = smov 0   ;;  %s1405_s22 = smov 0  }
   0x6   :  { %s1407_s23 = smov 0   ;;  %s1409_s24 = smov 0  }
   0x7   :  { %s1411_s25 = smov 0   ;;  %s1413_s26 = smov 0  }
   0x8 LB: > { %s1040_s27 = sadd.s32 4294967295, %s1354_s26   ;;  %s1041_s28 = sadd.s32 4294967294, %s1354_s26   ;;  %s1354_s26 = sphi %s1413_s26, %s23_s26   ;;  %s1350_s25 = sphi %s1411_s25, %s1665_s25   ;;  %s1346_s24 = sphi %s1409_s24, %s1664_s24   ;;  %s1342_s23 = sphi %s1407_s23, %s1663_s23   ;;  %s1338_s22 = sphi %s1405_s22, %s1662_s22   ;;  %s1334_s21 = sphi %s1403_s21, %s1661_s21  }
   0x9   : > { %s35_s29 = sadd.s32 1, %s1350_s25  ;;  %s166_s30 = sadd.s32 1, %s1342_s23 }
   0xa   : > { %p37_p0 = scmp.ge.s32.totalorder %s35_s29, 2  ;;  %p176_p1 = scmp.ne.s32.totalorder %s1342_s23, %s1338_s22 }
   0xb   : > { %p177_p2 = scmp.eq.s32.totalorder %s1040_s27, 1  ;;  %p182_p3 = scmp.ne.s32.totalorder %s1338_s22, %s1334_s21 }
   0xc   : > { %s1667_s29 = smov (%p37_p0, %s35_s29), 0  ;;  %p183_p5 = scmp.eq.s32.totalorder %s1041_s28, 1 }
   0xd   : > { %p1443_p4 = por %p177_p2, %p176_p1  ;;  %s161_s8 = ssub.s32 %s1350_s25, %s1667_s29 }
   0xe   : > { %p1044_p6 = scmp.ge.s32.totalorder %s1354_s26, 1  ;;  %p164_p7 = scmp.eq.s32.totalorder %s161_s8, 0 }
   0xf   : > { %p1450_p8 = por %p183_p5, %p182_p3  ;;  %p259_p9 = scmp.lt.s32.totalorder %s1354_s26, 3 }
  0x10   : > { %s1456_s10 = scalar_select %p164_p7, %s1342_s23, %s166_s30  }
  0x11   : > { %p260_p10 = pnand %p1044_p6, %p259_p9 }
  0x12   : > { %p304_p11 = scmp.lt.s32.totalorder (!%p260_p10), %s1346_s24, 1  ;;  %s1660_s0 = sld [smem:[#allocation9_spill]] (!%p260_p10) }
  0x13   : > { %263 = sbr.rel (%p260_p10) target bundleno = 1639 (0x667), region = 40  ;;  %s1358_s19 = smov (!%p260_p10), 120  }
  0x14   : > { %s1359_s20 = smov (!%p260_p10), 112   ;;  %s1360_s27 = smov (!%p260_p10), 104  }
  0x15   : > { %s1361_s14 = smov (!%p260_p10), 8   ;;  %s1081_s28 = sshll.u32 (!%p260_p10), %s1346_s24, 8 }
  0x16   : > { %s1364_s16 = smov (!%p260_p10), [#allocation5]  }
  0x17   : > { %s1252_s17 = sshll.u32 (!%p260_p10), %s1364_s16, 4  ;;  %s1253_s17 = int_to_ptr.vmem [resolvable:$false] %s1252_s17 }
  0x18   : > { %v1356_v0 = vmov 0.0   ;;  %vm1357_vm0 = vmmov 0   ;;  %s305_s11 = scalar_select %p304_p11, %s1346_s24, 1  ;;  %vm323_vm1 = vcmask 64512   ;;  %vm387_vm2 = vcmask 1043456  }
  0x19   : > { %1101 = vmatprep.subr.bf16.mxu0 %v1356_v0  ;;  %1103 = vmatprep.mubr.msk.bf16.mxu0 %vm1357_vm0, %v1356_v0  ;;  %vm382_vm3 = vcmask 60416   ;;  %vm561_vm4 = vcmask 126016   ;;  %vm682_vm5 = vcmask 191616   ;;  %vm803_vm6 = vcmask 257216  }
  0x1a   : > { %1107 = vmatprep.subr.bf16.mxu1 %v1356_v0  ;;  %1109 = vmatprep.mubr.msk.bf16.mxu1 %vm1357_vm0, %v1356_v0  ;;  %s1466_s12 = sshll.u32 %s305_s11, 2  ;;  %s1499_s11 = sand.u32 1, %s1338_s22   ;;  %vm829_vm7 = vcmask 261120  }
  0x1b   : > { %s314_s15 = scalar_lea.vmem %s1651_s1, %s1466_s12  ;;  %s310_s18 = scalar_lea.vmem %s1660_s0, %s1466_s12 }
  0x1c   : > { %v321_v1 = vld [vmem:[%s314_s15] sm:$0xf]  ;;  %s318_s8 = scalar_lea.vmem %s1652_s2, %s1466_s12  ;;  %s1046_s13 = sshll.u32 %s1499_s11, 4 }
  0x1d   : > { %v328_v2 = vsel %vm323_vm1, %v321_v1, 0  ;;  %v320_v3 = vld [vmem:[%s310_s18] sm:$0xf]  ;;  %v1053_v9 = vcombine.low %v321_v1, %v321_v1  ;;  %s1504_s12 = scalar_lea.vmem [#allocation5], %s1046_s13  ;;  %s1362_s15 = smov 16  }
  0x1e   : > { %1102 = vmatpush3.bf16.xpose.msra.mxu0 %v328_v2  ;;  %v1052_v10 = vcombine.low %v320_v3, %v320_v3  ;;  %v1492_v16 = vld [vmem:[%s318_s8] sm:$0xf]  ;;  %s1569_s13 = scalar_lea.hbm %s1656_s6, %s1081_s28 }
  0x1f   : > { %1119 = vmatprep.subr.bf16.mxu0 %v1356_v0  ;;  %441 = vrot.lane.b32.xlu1 %v1053_v9, %s1358_s19  ;;  %v389_v17 = vsel %vm387_vm2, %v1492_v16, 0  ;;  %v1056_v61 = vcombine.low %v1492_v16, %v1492_v16 }
  0x20   : > { %1108 = vmatpush3.bf16.msra.mxu1 %v389_v17 }
  0x21   : > { %1113 = vmatprep.subr.bf16.mxu1 %v1356_v0 }
  0x23   : > { %436 = vrot.lane.b32.xlu1 %v1052_v10, %s1358_s19 }
  0x25   : > { %1104 = vmatmul.mubr.msk.bf16.vlgmr.msra.gmra.mxu0 %vm323_vm1, %v320_v3 }
  0x26   : > { %1121 = vmatprep.mubr.msk.bf16.mxu0 %vm1357_vm0, %v1356_v0 }
  0x27   : > { %563 = vrot.lane.b32.xlu1 %v1052_v10, %s1359_s20 }
  0x2b   : > { %686 = vrot.lane.b32.xlu1 %v1053_v9, %s1360_s27 }
  0x2f   : > { %684 = vrot.lane.b32.xlu1 %v1052_v10, %s1360_s27 }
  0x91   : > { %v442_v20 = vpop.permute.xlu1 %441 }
  0x92   : > { %v447_v22 = vsel %vm323_vm1, %v442_v20, 0 }
  0x95   : > { %v437_v24 = vpop.permute.xlu1 %436 }
  0x99   : > { %v564_v26 = vpop.permute.xlu1 %563 }
  0x9d   : > { %v687_v28 = vpop.permute.xlu1 %686 }
  0x9e   : > { %v692_v29 = vsel %vm323_vm1, %v687_v28, 0 }
  0xa1   : > { %v685_v30 = vpop.permute.xlu1 %684 }
  0xe5   : > { %v364_v4 = vpop.f32.mrf.mxu0 }
  0xe6   : > { %v370_v5 = vsel %vm323_vm1, %v364_v4, -inf }
  0xe7   : > { %371 = vmax.xlane.f32.xlu0 %v370_v5  ;;  %v1105_v6 = vpop.f32.mrf.mxu0 }
  0xe9   : > { %v367_v7 = vpop.f32.mrf.mxu0 }
  0xeb   : > { %v1106_v8 = vpop.f32.mrf.mxu0 }
 0x170   : > { %v372_v11 = vpop.xlane.xlu0 %371 }
 0x171   : > { %v373_v12 = vsub.f32 %v364_v4, %v372_v11 }
 0x173   : > { %v374_v13 = vmul.f32 1.442695, %v373_v12 }
 0x175   : > { %1232 = vpow2.f32 %v374_v13 }
 0x182   : > { %v1233_v14 = vpop.eup %1232 }
 0x183   : > { %v376_v15 = vsel %vm323_vm1, %v1233_v14, 0.0 }
 0x184   : > { %377 = vadd.xlane.f32.xlu0 %v376_v15 }
 0x19a   : > { %565 = vrot.lane.b32.xlu0 %v1053_v9, %s1359_s20 }
 0x20d   : > { %v378_v18 = vpop.xlane.xlu0 %377 }
 0x20e   : > { %1234 = vrcp.f32 %v378_v18 }
 0x211   : > { %v566_v25 = vpop.permute.xlu0 %565 }
 0x212   : > { %v571_v27 = vsel %vm323_vm1, %v566_v25, 0 }
 0x21b   : > { %v1235_v19 = vpop.eup %1234 }
 0x21c   : > { %v380_v21 = vmul.f32 %v1235_v19, %v1233_v14 }
 0x21e   : > { %v381_v23 = vpack.c.bf16 %v380_v21, %v380_v21 }
 0x220   : > { %1110 = vmatmul.mubr.msk.bf16.vlgmr.msra.gmra.mxu1 %vm323_vm1, %v381_v23  ;;  %383 = vst.msk [vmem:[%s1504_s12] sm:$0xf] %vm382_vm3, %v381_v23 }
 0x221   : > { %1114 = vmatpush3.bf16.xpose.msra.mxu1 %v447_v22  ;;  %1115 = vmatprep.mubr.msk.bf16.mxu1 %vm1357_vm0, %v1356_v0 }
 0x222   : > { %1125 = vmatprep.subr.bf16.mxu1 %v1356_v0 }
 0x228   : > { %1116 = vmatmul.mubr.msk.bf16.vlgmr.msra.gmra.mxu1 %vm323_vm1, %v437_v24 }
 0x229   : > { %1126 = vmatpush3.bf16.xpose.msra.mxu1 %v571_v27  ;;  %1127 = vmatprep.mubr.msk.bf16.mxu1 %vm1357_vm0, %v1356_v0 }
 0x22a   : > { %1137 = vmatprep.subr.bf16.mxu1 %v1356_v0 }
 0x230   : > { %1128 = vmatmul.mubr.msk.bf16.vlgmr.msra.gmra.mxu1 %vm323_vm1, %v564_v26 }
 0x231   : > { %1138 = vmatpush3.bf16.xpose.msra.mxu1 %v692_v29  ;;  %1139 = vmatprep.mubr.msk.bf16.mxu1 %vm1357_vm0, %v1356_v0 }
 0x232   : > { %1149 = vmatprep.subr.bf16.mxu1 %v1356_v0 }
 0x238   : > { %1140 = vmatmul.mubr.msk.bf16.vlgmr.msra.gmra.mxu1 %vm323_vm1, %v685_v30 }
 0x239   : > { %1153 = vmatprep.mubr.msk.bf16.mxu1 %vm1357_vm0, %v1356_v0 }
 0x2e0   : > { %v425_v31 = vpop.f32.mrf.mxu1 }
 0x2e1   : > { %v431_v32 = vpack.c.bf16 %v425_v31, %v425_v31 }
 0x2e2   : > { %v1111_v33 = vpop.f32.mrf.mxu1 }
 0x2e3   : > { %432 = vst.msk [vmem:[#allocation2] sm:$0xf] %vm382_vm3, %v431_v32  ;;  %v1230_v32 = vld [vmem:[%s1653_s3 + $0x8] sm:$0xff]   ;;  %v1231_v33 = vld [vmem:[%s1653_s3] sm:$0xff]  }
 0x2e4   : > { %v428_v34 = vpop.f32.mrf.mxu1  ;;  %1150 = vmatpush3.bf16.msra.mxu1 %v1230_v32 }
 0x2e5   : > { %1151 = vmatprep.subr.bf16.mxu1 %v1356_v0 }
 0x2e6   : > { %v1112_v35 = vpop.f32.mrf.mxu1 }
 0x2e8   : > { %v483_v36 = vpop.f32.mrf.mxu1  ;;  %1152 = vmatpush3.bf16.msra.mxu1 %v1231_v33 }
 0x2e9   : > { %v489_v37 = vsel %vm323_vm1, %v483_v36, -inf }
 0x2ea   : > { %490 = vmax.xlane.f32.xlu1 %v489_v37  ;;  %v1117_v38 = vpop.f32.mrf.mxu1 }
 0x2ec   : > { %v486_v39 = vpop.f32.mrf.mxu1 }
 0x2ee   : > { %v1118_v40 = vpop.f32.mrf.mxu1 }
 0x2f0   : > { %v607_v41 = vpop.f32.mrf.mxu1 }
 0x2f1   : > { %v613_v42 = vsel %vm323_vm1, %v607_v41, -inf }
 0x2f2   : > { %614 = vmax.xlane.f32.xlu0 %v613_v42  ;;  %v1129_v43 = vpop.f32.mrf.mxu1 }
 0x2f4   : > { %v610_v44 = vpop.f32.mrf.mxu1 }
 0x2f6   : > { %v1130_v45 = vpop.f32.mrf.mxu1 }
 0x2f8   : > { %v728_v46 = vpop.f32.mrf.mxu1 }
 0x2f9   : > { %v734_v47 = vsel %vm323_vm1, %v728_v46, -inf }
 0x2fa   : > { %735 = vmax.xlane.f32.xlu1 %v734_v47  ;;  %v1141_v48 = vpop.f32.mrf.mxu1 }
 0x2fc   : > { %v731_v49 = vpop.f32.mrf.mxu1 }
 0x2fe   : > { %v1142_v50 = vpop.f32.mrf.mxu1 }
 0x373   : > { %v491_v51 = vpop.xlane.xlu1 %490 }
 0x374   : > { %v492_v52 = vsub.f32 %v483_v36, %v491_v51 }
 0x376   : > { %v493_v53 = vmul.f32 1.442695, %v492_v52 }
 0x378   : > { %1236 = vpow2.f32 %v493_v53 }
 0x37b   : > { %v615_v54 = vpop.xlane.xlu0 %614 }
 0x37c   : > { %v616_v55 = vsub.f32 %v607_v41, %v615_v54 }
 0x37e   : > { %v617_v56 = vmul.f32 1.442695, %v616_v55 }
 0x380   : > { %1238 = vpow2.f32 %v617_v56 }
 0x383   : > { %v736_v62 = vpop.xlane.xlu1 %735 }
 0x384   : > { %v737_v63 = vsub.f32 %v728_v46, %v736_v62 }
 0x385   : > { %v1237_v57 = vpop.eup %1236 }
 0x386   : > { %v495_v58 = vsel %vm323_vm1, %v1237_v57, 0.0  ;;  %v738_v1 = vmul.f32 1.442695, %v737_v63 }
 0x387   : > { %496 = vadd.xlane.f32.xlu1 %v495_v58 }
 0x388   : > { %1240 = vpow2.f32 %v738_v1 }
 0x38d   : > { %v1239_v59 = vpop.eup %1238 }
 0x38e   : > { %v619_v60 = vsel %vm323_vm1, %v1239_v59, 0.0 }
 0x38f   : > { %620 = vadd.xlane.f32.xlu0 %v619_v60 }
 0x395   : > { %v1241_v2 = vpop.eup %1240 }
 0x396   : > { %v740_v3 = vsel %vm323_vm1, %v1241_v2, 0.0 }
 0x398   : > { %627 = vrot.lane.b32.xlu1 %v1056_v61, %s1359_s20  ;;  %s1363_s20 = smov 24  }
 0x3a5   : > { %506 = vrot.lane.b32.xlu0 %v1056_v61, %s1358_s19 }
 0x3bc   : > { %741 = vadd.xlane.f32.xlu1 %v740_v3 }
 0x3cd   : > { %748 = vrot.lane.b32.xlu1 %v1056_v61, %s1360_s27  ;;  %s908_s27 = sshll.u32 %s1504_s12, 4  ;;  %s1564_s27 = int_to_ptr.vmem [resolvable:$true] %s908_s27 }
 0x3ce   : > { %p1255_p1 = scmp.lt.s32.totalorder %s1564_s27, %s1253_s17 }
 0x410   : > { %v497_v4 = vpop.xlane.xlu1 %496 }
 0x411   : > { %1242 = vrcp.f32 %v497_v4 }
 0x414   : > { %v628_v10 = vpop.permute.xlu1 %627 }
 0x415   : > { %v633_v12 = vsel %vm387_vm2, %v628_v10, 0 }
 0x418   : > { %v621_v5 = vpop.xlane.xlu0 %620 }
 0x419   : > { %1244 = vrcp.f32 %v621_v5 }
 0x41c   : > { %v507_v6 = vpop.permute.xlu0 %506 }
 0x41d   : > { %v512_v7 = vsel %vm387_vm2, %v507_v6, 0 }
 0x41e   : > { %v1243_v8 = vpop.eup %1242  ;;  %1120 = vmatpush3.bf16.msra.mxu0 %v512_v7 }
 0x41f   : > { %1131 = vmatprep.subr.bf16.mxu0 %v1356_v0  ;;  %v499_v9 = vmul.f32 %v1243_v8, %v1237_v57 }
 0x421   : > { %v500_v11 = vpack.c.bf16 %v499_v9, %v499_v9 }
 0x423   : > { %1122 = vmatmul.mubr.msk.bf16.vlgmr.msra.gmra.mxu0 %vm323_vm1, %v500_v11  ;;  %1055 = vst.msk [vmem:[%s1504_s12 + $0x4] sm:$0xf] %vm382_vm3, %v500_v11 }
 0x424   : > { %1132 = vmatpush3.bf16.msra.mxu0 %v633_v12  ;;  %1133 = vmatprep.mubr.msk.bf16.mxu0 %vm1357_vm0, %v1356_v0 }
 0x425   : > { %1143 = vmatprep.subr.bf16.mxu0 %v1356_v0 }
 0x426   : > { %v1245_v13 = vpop.eup %1244 }
 0x427   : > { %v623_v14 = vmul.f32 %v1245_v13, %v1239_v59 }
 0x429   : > { %v624_v15 = vpack.c.bf16 %v623_v14, %v623_v14 }
 0x42b   : > { %1134 = vmatmul.mubr.msk.bf16.vlgmr.msra.gmra.mxu0 %vm323_vm1, %v624_v15  ;;  %1060 = vst.msk [vmem:[%s1504_s12 + $0x8] sm:$0xf] %vm382_vm3, %v624_v15 }
 0x42c   : > { %1145 = vmatprep.mubr.msk.bf16.mxu0 %vm1357_vm0, %v1356_v0 }
 0x445   : > { %v742_v16 = vpop.xlane.xlu1 %741 }
 0x446   : > { %1246 = vrcp.f32 %v742_v16 }
 0x449   : > { %v749_v17 = vpop.permute.xlu1 %748 }
 0x44a   : > { %v754_v18 = vsel %vm387_vm2, %v749_v17, 0 }
 0x44b   : > { %1144 = vmatpush3.bf16.msra.mxu0 %v754_v18 }
 0x453   : > { %v1247_v19 = vpop.eup %1246 }
 0x454   : > { %v744_v20 = vmul.f32 %v1247_v19, %v1241_v2 }
 0x456   : > { %v745_v21 = vpack.c.bf16 %v744_v20, %v744_v20 }
 0x458   : > { %1146 = vmatmul.mubr.msk.bf16.vlgmr.msra.gmra.mxu0 %vm323_vm1, %v745_v21  ;;  %1064 = vst.msk [vmem:[%s1504_s12 + $0xc] sm:$0xf] %vm382_vm3, %v745_v21  ;;  %s1254_s12 = scalar_lea.vmem %s1253_s17, 512 }
 0x4e3   : > { %v548_v22 = vpop.f32.mrf.mxu0 }
 0x4e4   : > { %v1078_v23 = vpack.c.bf16 %v548_v22, %v548_v22 }
 0x4e5   : > { %v1123_v24 = vpop.f32.mrf.mxu0 }
 0x4e6   : > { %558 = vrot.lane.b32.xlu0 %v1078_v23, %s1361_s14  ;;  %s880_s14 = scalar_lea.sflag [#allocation6], %s1499_s11 }
 0x4e7   : > { %v551_v25 = vpop.f32.mrf.mxu0 }
 0x4e9   : > { %v1124_v26 = vpop.f32.mrf.mxu0 }
 0x4eb   : > { %v669_v27 = vpop.f32.mrf.mxu0 }
 0x4ec   : > { %v1079_v28 = vpack.c.bf16 %v669_v27, %v669_v27 }
 0x4ed   : > { %v1135_v29 = vpop.f32.mrf.mxu0 }
 0x4ee   : > { %679 = vrot.lane.b32.xlu1 %v1079_v28, %s1362_s15  ;;  %s1248_s15 = scalar_lea.vmem %s1564_s27, 256 }
 0x4ef   : > { %v672_v30 = vpop.f32.mrf.mxu0  ;;  %p1249_p12 = scmp.ne.s32.totalorder %s1564_s27, %s1248_s15  ;;  %p1256_p2 = scmp.lt.s32.totalorder %s1254_s12, %s1248_s15 }
 0x4f1   : > { %v1136_v31 = vpop.f32.mrf.mxu0  ;;  %p1250_p13 = pnand %p1249_p12, %p1443_p4  ;;  %p1257_p3 = por %p1256_p2, %p1255_p1 }
 0x4f3   : > { %p1251_p0 = pneg %p1250_p13 }
 0x4f5   : > { %p1258_p5 = pnand %p1257_p3, %p1251_p0 }
 0x518   : > { %v790_v34 = vpop.f32.mrf.mxu0 }
 0x519   : > { %v1080_v35 = vpack.c.bf16 %v790_v34, %v790_v34 }
 0x51a   : > { %v1147_v36 = vpop.f32.mrf.mxu0 }
 0x51b   : > { %800 = vrot.lane.b32.xlu0 %v1080_v35, %s1363_s20 }
 0x51c   : > { %v793_v37 = vpop.f32.mrf.mxu0 }
 0x51e   : > { %v1148_v38 = vpop.f32.mrf.mxu0 }
 0x558   : > { %v559_v39 = vpop.permute.xlu0 %558 }
 0x559   : > { %562 = vst.msk [vmem:[#allocation2] sm:$0xf] %vm561_vm4, %v559_v39 }
 0x560   : > { %v680_v40 = vpop.permute.xlu1 %679 }
 0x561   : > { %683 = vst.msk [vmem:[#allocation2] sm:$0xf] %vm682_vm5, %v680_v40 }
 0x58d   : > { %v801_v0 = vpop.permute.xlu0 %800 }
 0x58e   : > { %804 = vst.msk [vmem:[#allocation2] sm:$0xf] %vm803_vm6, %v801_v0 }
 0x595   : > { %v805_v41 = vld [vmem:[#allocation2] sm:$0xf] }
 0x596   : > { %1154 = vmatmul.mubr.msk.bf16.vlgmr.msra.gmra.mxu1 %vm829_vm7, %v805_v41 }
 0x597   : > { %1261 = shalt.err (!%p1258_p5)
}
 0x598   : > { %s1262_s18 = scalar_lea.hbm %s1569_s13, 256  ;;  %s1266_s28 = scalar_lea.hbm %s1656_s6, 512 }
 0x599   : > { %p1263_p6 = scmp.ne.s32.totalorder %s1569_s13, %s1262_s18  ;;  %p1267_p10 = scmp.lt.s32.totalorder %s1569_s13, %s1656_s6 }
 0x59a   : > { %p1268_p11 = scmp.lt.s32.totalorder %s1266_s28, %s1262_s18 }
 0x59b   : > { %p1264_p7 = pnand %p1263_p6, %p1443_p4 }
 0x59c   : > { %p1269_p12 = por %p1268_p11, %p1267_p10 }
 0x59d   : > { %p1265_p9 = pneg %p1264_p7 }
 0x59f   : > { %p1270_p13 = pnand %p1269_p12, %p1265_p9 }
 0x5a1   : > { %1273 = shalt.err (!%p1270_p13)
}
 0x5a2   : > { %s1365_s15 = smov 64   ;;  %s1366_s16 = smov 4   ;;  %v1067_v42 = vld [vmem:[%s1654_s4] ss:$0 sm:$0xff] }
 0x5a3   : > { %1158 = dma.vmem_to_hbm [thread:$0]  (%p1443_p4), %s1564_s27, 256, %s1569_s13, %s880_s14, %s1365_s15, %s1365_s15, %s1366_s16  }
 0x5a4   : > { %s1045_s17 = sshll.u32 %s1499_s11, 3  ;;  %s1073_s18 = sshll.u32 %s1346_s24, 7 }
 0x5a5   : > { %s296_s20 = scalar_lea.vmem [#allocation3], %s1045_s17  ;;  %s1602_s0 = scalar_lea.hbm %s1655_s5, %s1073_s18 }
 0x5a6   : > { %s894_s28 = sshll.u32 %s296_s20, 4  ;;  %s875_s27 = scalar_lea.sflag [#allocation4], %s1499_s11  ;;  %s1604_s28 = int_to_ptr.vmem [resolvable:$true] %s894_s28 }
 0x5a7   : > { %s1274_s24 = scalar_lea.vmem %s1604_s28, 128  ;;  %s1367_s13 = smov [#allocation3]  }
 0x5a8   : > { %p1275_p0 = scmp.ne.s32.totalorder %s1604_s28, %s1274_s24  ;;  %s1278_s14 = sshll.u32 %s1367_s13, 4  ;;  %s1279_s14 = int_to_ptr.vmem [resolvable:$false] %s1278_s14 }
 0x5a9   : > { %s1280_s15 = scalar_lea.vmem %s1279_s14, 256  ;;  %p1281_p3 = scmp.lt.s32.totalorder %s1604_s28, %s1279_s14 }
 0x5aa   : > { %p1276_p1 = pnand %p1275_p0, %p1443_p4  ;;  %p1282_p5 = scmp.lt.s32.totalorder %s1280_s15, %s1274_s24 }
 0x5ac   : > { %p1277_p2 = pneg %p1276_p1  ;;  %p1283_p6 = por %p1282_p5, %p1281_p3 }
 0x5ae   : > { %p1284_p7 = pnand %p1283_p6, %p1277_p2 }
 0x656   : > { %v867_v43 = vpop.f32.mrf.mxu1 }
 0x657   : > { %v868_v44 = vadd.f32 %v1067_v42, %v867_v43 }
 0x658   : > { %v1155_v45 = vpop.f32.mrf.mxu1 }
 0x659   : > { %873 = vst.msk [vmem:[%s296_s20] sm:$0xff] %vm829_vm7, %v868_v44 }
 0x65a   : > { %v870_v46 = vpop.f32.mrf.mxu1 }
 0x65b   : > { %1287 = shalt.err (!%p1284_p7)
}
 0x65c   : > { %s1288_s16 = scalar_lea.hbm %s1602_s0, 128  ;;  %s1292_s12 = scalar_lea.hbm %s1655_s5, 256 }
 0x65d   : > { %p1289_p9 = scmp.ne.s32.totalorder %s1602_s0, %s1288_s16  ;;  %p1293_p12 = scmp.lt.s32.totalorder %s1602_s0, %s1655_s5 }
 0x65e   : > { %p1294_p13 = scmp.lt.s32.totalorder %s1292_s12, %s1288_s16 }
 0x65f   : > { %p1290_p10 = pnand %p1289_p9, %p1443_p4 }
 0x660   : > { %p1295_p0 = por %p1294_p13, %p1293_p12 }
 0x661   : > { %p1291_p11 = pneg %p1290_p10 }
 0x663   : > { %p1296_p1 = pnand %p1295_p0, %p1291_p11 }
 0x665   : > { %1299 = shalt.err (!%p1296_p1)
}
 0x666   : > { %1157 = dma.vmem_to_hbm [thread:$0]  (%p1443_p4), %s1604_s28, 128, %s1602_s0, %s875_s27   ;;  %v1156_v47 = vpop.f32.mrf.mxu1 }
 0x667 PF: > { %p1168_p2 = scmp.ge.s32.totalorder %s1354_s26, 2  ;;  %s923_s20 = sand.u32 1, %s1334_s21  }
 0x668   : > { %s924_s30 = scalar_lea.sflag [#allocation4], %s923_s20 }
 0x669   : > { %p1162_p3 = pnand %p1168_p2, %p1450_p8 }
 0x66b   : > { %p1163_p5 = pneg %p1162_p3 }
 0x66d   : > { %1325 = dma.done.wait (%p1163_p5), %s924_s30, 128  }
 0x66e   : > { %1327 = vsyncadd (%p1163_p5), %s924_s30, 4294967168  ;;  %s933_s8 = scalar_lea.sflag [#allocation6], %s923_s20 }
 0x66f   : > { %1329 = dma.done.wait (%p1163_p5), %s933_s8, 256  }
 0x670   : > { %1331 = vsyncadd (%p1163_p5), %s933_s8, 4294967040  ;;  %s23_s26 = sadd.s32 1, %s1354_s26   ;;  %s1661_s21 = smov %s1338_s22 }
 0x671   : > { %p20_p6 = scmp.ge.s32.totalorder %s23_s26, 4   ;;  %s1662_s22 = smov %s1342_s23 }
 0x672   : > { %s1663_s23 = smov %s1456_s10  ;;  %s1664_s24 = smov %s1350_s25 }
 0x673   : > { %s1665_s25 = smov %s1667_s29  ;;  %22 = sbr.rel (!%p20_p6) target bundleno = 8 (0x8), region = 101 }
 0x678   :  { %938 = vsyncpa [#allocation4], 1 }
 0x679   :  { %940 = vsyncpa [#allocation4 + $0x1], 1 }
 0x67a   :  { %941 = vsyncpa [#allocation6], 1 }
 0x67b   :  { %943 = vsyncpa [#allocation6 + $0x1], 1 }

</bundles_post_ra>
